<compile_context>
chip_gen: v7x
topology: tpu7x:2x2x1
jax: 0.10.0
libtpu: 0.0.40
codegen_flags: <defaults>
</compile_context>

<pallas_src>
import functools

import numpy as np

import jax
import jax.numpy as jnp
from jax.experimental import pallas as pl
from jax.experimental.pallas import tpu as pltpu

_HIDDEN = 64


# ----------------------------- small helpers ------------------------------

def _round8(n):
    return ((n + 7) // 8) * 8


def _round16(n):
    return ((n + 15) // 16) * 16


def _softmax(x):
    m = jnp.max(x, axis=-1, keepdims=True)
    e = jnp.exp(x - m)
    return e / jnp.sum(e, axis=-1, keepdims=True)     # exact divide (user-facing)


def _softplus(x):
    # matches F.softplus(beta=1, threshold=20)
    return jnp.where(x > 20.0, x, jnp.log1p(jnp.exp(jnp.minimum(x, 20.0))))


def _sigmoid(x):
    # sign-stable sigmoid, single EUP op (tanh form)
    return 0.5 * jnp.tanh(0.5 * x) + 0.5


# ----------------------- packed parameter slab layout ----------------------

def _make_layout(x_dim, z_dim, y_dim, hidden=_HIDDEN):
    """Row layout of the single (rows, 128) bf16 parameter slab.

    Every weight block starts at a 16-row-aligned offset (bf16 packs 16
    sublanes per vreg) and occupies columns [0, out_dim).  Biases live
    one-per-row at the tail.
    """
    assert hidden == 64
    assert y_dim <= 128 and z_dim <= 32            # hidden + 2*z_dim <= 128
    weight_shapes = [
        ("w_x",     x_dim,      2 * hidden),            # [w_qyx1 | w_qz1[:x_dim]]
        ("w_lg",    hidden,     y_dim),                  # logits head
        ("w_y",     y_dim,      hidden + 2 * z_dim),     # [w_qz1[x_dim:] | w_ymu | w_yvar]
        ("w_muvar", hidden,     2 * z_dim),              # [w_mu | w_var]
        ("w_g1",    z_dim,      hidden),                 # pxz first linear
        ("w_g2",    hidden,     hidden),                 # pxz second linear
        ("w_fr1",   hidden,     2 * hidden),             # [fc_f[0] | fc_r[0]]  (128 lanes)
        ("w_fr2",   2 * hidden, 7),                      # block-diag [fc_f[2] ; fc_r[2]]
    ]
    weights = {}
    off = 0
    for name, rows, cols in weight_shapes:
        assert cols <= 128
        weights[name] = (off, rows, cols)
        off += _round16(rows)

    bias_shapes = [
        ("b_qyx1", hidden), ("b_lg", y_dim), ("b_qz1", hidden),
        ("b_muvar", 2 * z_dim), ("b_ymuvar", 2 * z_dim),
        ("b_g1", hidden), ("b_g2", hidden),
        ("b_fr1", 2 * hidden), ("b_fr2", 7),
    ]
    biases = {}
    for i, (name, cols) in enumerate(bias_shapes):
        biases[name] = (off + i, cols)
    off += _round16(len(bias_shapes))
    return {"weights": weights, "biases": biases, "rows": off}


def pack_params(params, x_dim, z_dim, y_dim, hidden=_HIDDEN):
    """Fuse sibling / shared-LHS heads and pack everything into one bf16 slab."""
    layout = _make_layout(x_dim, z_dim, y_dim, hidden)

    w_fr2 = jnp.zeros((2 * hidden, 7), jnp.float32)
    w_fr2 = w_fr2.at[:hidden, :3].set(params["w_f2"])
    w_fr2 = w_fr2.at[hidden:, 3:].set(params["w_r2"])

    fused_w = {
        "w_x": jnp.concatenate([params["w_qyx1"], params["w_qz1"][:x_dim]], axis=1),
        "w_lg": params["w_lg"],
        "w_y": jnp.concatenate(
            [params["w_qz1"][x_dim:], params["w_ymu"], params["w_yvar"]], axis=1),
        "w_muvar": jnp.concatenate([params["w_mu"], params["w_var"]], axis=1),
        "w_g1": params["w_g1"],
        "w_g2": params["w_g2"],
        "w_fr1": jnp.concatenate([params["w_f1"], params["w_r1"]], axis=1),
        "w_fr2": w_fr2,
    }
    fused_b = {
        "b_qyx1": params["b_qyx1"],
        "b_lg": params["b_lg"],
        "b_qz1": params["b_qz1"],
        "b_muvar": jnp.concatenate([params["b_mu"], params["b_var"]], axis=0),
        "b_ymuvar": jnp.concatenate([params["b_ymu"], params["b_yvar"]], axis=0),
        "b_g1": params["b_g1"],
        "b_g2": params["b_g2"],
        "b_fr1": jnp.concatenate([params["b_f1"], params["b_r1"]], axis=0),
        "b_fr2": jnp.concatenate([params["b_f2"], params["b_r2"]], axis=0),
    }

    slab = jnp.zeros((layout["rows"], 128), jnp.float32)
    for name, (off, rows, cols) in layout["weights"].items():
        w = fused_w[name]
        assert w.shape == (rows, cols), (name, w.shape, (rows, cols))
        slab = slab.at[off:off + rows, :cols].set(w.astype(jnp.float32))
    for name, (row, cols) in layout["biases"].items():
        b = fused_b[name].reshape(-1).astype(jnp.float32)
        assert b.shape == (cols,), (name, b.shape, cols)
        slab = slab.at[row, :cols].set(b)
    return slab.astype(jnp.bfloat16), layout


# ------------------------------- the kernel -------------------------------

def gmvae_kernel(layout, dims, in_ref, invt_ref, p_ref, out_ref):
    x_dim, z_dim, y_dim, hidden = dims
    f32, bf16 = jnp.float32, jnp.bfloat16

    def W(name):
        off, rows, cols = layout["weights"][name]
        return p_ref[off:off + rows, :cols]              # bf16 MXU operand

    def Bv(name):
        row, cols = layout["biases"][name]
        return p_ref[row:row + 1, :cols].astype(f32)     # bias added in f32

    def mm(a, wname):
        # bf16 operands, f32 accumulation on the MXU
        return jnp.dot(a.astype(bf16), W(wname), preferred_element_type=f32)

    inv_t = invt_ref[0]                                  # SMEM scalar (1/temperature)

    xin = in_ref[...]                                    # [x | gumbel | eps]
    x = xin[:, :x_dim]
    gumbel = xin[:, x_dim:x_dim + y_dim]
    eps = xin[:, x_dim + y_dim:]

    # ---------------- InferenceNet.qyx (fused x-path) ----------------
    xh = mm(x, "w_x")                                    # (B, 128): [qyx1 | qz1_x]
    h = jnp.maximum(xh[:, :hidden] + Bv("b_qyx1"), 0.0)
    pre_qz_x = xh[:, hidden:]                            # x-part of qzxy pre-act

    logits = mm(h, "w_lg") + Bv("b_lg")
    prob = _softmax(logits)
    # Soft Gumbel-softmax sample (forward() default hard=0).
    # TODO(synk): hard (straight-through) Gumbel-softmax branch not implemented.
    y = _softmax((logits + gumbel) * inv_t)

    # ---------------- InferenceNet.qzxy + GenerativeNet.pzy (fused y-path) ----
    yh = mm(y, "w_y")                                    # (B, 64+2z): [qz1_y | y_mu | y_var]
    h2 = jnp.maximum(pre_qz_x + yh[:, :hidden] + Bv("b_qz1"), 0.0)
    ymv = yh[:, hidden:] + Bv("b_ymuvar")
    y_mu = ymv[:, :z_dim]
    y_var = _softplus(ymv[:, z_dim:])

    muvar = mm(h2, "w_muvar") + Bv("b_muvar")            # fused [mu | var]
    mu = muvar[:, :z_dim]
    var = _softplus(muvar[:, z_dim:])
    z = mu + eps * jnp.sqrt(var + 1e-10)                 # Gaussian.reparameterize

    # ---------------- GenerativeNet.pxz ----------------
    g1 = jnp.maximum(mm(z, "w_g1") + Bv("b_g1"), 0.0)
    x_f = _sigmoid(mm(g1, "w_g2") + Bv("b_g2"))

    # ---------------- fused force / rot heads ----------------
    fr1 = jnp.maximum(mm(x_f, "w_fr1") + Bv("b_fr1"), 0.0)   # (B, 128) full vreg
    fr2 = mm(fr1, "w_fr2") + Bv("b_fr2")                      # block-diag -> (B, 7)
    force = _sigmoid(fr2[:, :3])
    rot = fr2[:, 3:7]
    sq = jnp.sum(rot * rot, axis=1, keepdims=True)
    # F.normalize(dim=1): x / max(||x||, 1e-12)  ==  x * rsqrt(max(||x||^2, 1e-24))
    rot = rot * jax.lax.rsqrt(jnp.maximum(sq, 1e-24))

    # ---------------- single lane-dense packed output (one concat) ------------
    pieces = [mu, var, z, y_mu, y_var, logits, prob, y, rot, force]
    pad = out_ref.shape[-1] - sum(p.shape[-1] for p in pieces)
    if pad:
        pieces.append(jnp.zeros((xin.shape[0], pad), f32))
    out_ref[...] = jnp.concatenate(pieces, axis=-1)


# ------------------------------- parameters -------------------------------

def _xavier_normal(key, fan_in, fan_out):
    # stored (in, out) = transpose of PyTorch (out, in); xavier-normal std is
    # symmetric in fan_in/fan_out so this matches torch.nn.init.xavier_normal_.
    std = (2.0 / (fan_in + fan_out)) ** 0.5
    return jax.random.normal(key, (fan_in, fan_out), jnp.float32) * std


def init_params(key, x_dim, z_dim, y_dim, hidden_dim=_HIDDEN):
    ks = jax.random.split(key, 13)
    zeros = lambda n: jnp.zeros((n,), jnp.float32)
    return dict(
        # inference qyx
        w_qyx1=_xavier_normal(ks[0], x_dim, hidden_dim), b_qyx1=zeros(hidden_dim),
        w_lg=_xavier_normal(ks[1], hidden_dim, y_dim),   b_lg=zeros(y_dim),
        # inference qzxy
        w_qz1=_xavier_normal(ks[2], x_dim + y_dim, hidden_dim), b_qz1=zeros(hidden_dim),
        w_mu=_xavier_normal(ks[3], hidden_dim, z_dim),   b_mu=zeros(z_dim),
        w_var=_xavier_normal(ks[4], hidden_dim, z_dim),  b_var=zeros(z_dim),
        # generative p(z|y)
        w_ymu=_xavier_normal(ks[5], y_dim, z_dim),       b_ymu=zeros(z_dim),
        w_yvar=_xavier_normal(ks[6], y_dim, z_dim),      b_yvar=zeros(z_dim),
        # generative p(x|z)
        w_g1=_xavier_normal(ks[7], z_dim, hidden_dim),   b_g1=zeros(hidden_dim),
        w_g2=_xavier_normal(ks[8], hidden_dim, hidden_dim), b_g2=zeros(hidden_dim),
        # fc_f
        w_f1=_xavier_normal(ks[9], hidden_dim, hidden_dim), b_f1=zeros(hidden_dim),
        w_f2=_xavier_normal(ks[10], hidden_dim, 3),      b_f2=zeros(3),
        # fc_r
        w_r1=_xavier_normal(ks[11], hidden_dim, hidden_dim), b_r1=zeros(hidden_dim),
        w_r2=_xavier_normal(ks[12], hidden_dim, 4),      b_r2=zeros(4),
    )


# -------------------------------- wrapper ---------------------------------

_OUT_ORDER = ["mean", "var", "gaussian", "y_mean", "y_var",
              "logits", "prob_cat", "categorical", "rot", "force"]


def _out_columns(z_dim, y_dim):
    widths = dict(mean=z_dim, var=z_dim, gaussian=z_dim, y_mean=z_dim, y_var=z_dim,
                  logits=y_dim, prob_cat=y_dim, categorical=y_dim, rot=4, force=3)
    cols, c = {}, 0
    for name in _OUT_ORDER:
        cols[name] = (c, c + widths[name])
        c += widths[name]
    return cols, c


def _make_noise(noise_key, B, z_dim, y_dim):
    kg, kn = jax.random.split(noise_key)
    u = jax.random.uniform(kg, (B, y_dim), jnp.float32)
    gumbel = -jnp.log(-jnp.log(u + 1e-20) + 1e-20)
    eps = jax.random.normal(kn, (B, z_dim), jnp.float32)
    return gumbel, eps


def _choose_batch_block(Bp, in_width, out_width, max_block=512):
    """Pick a batch block: multiple of 8, divides Bp, <=512, fits a conservative
    VMEM budget, and leaves >=2 grid steps when Bp > 8 (v7x dual TensorCore)."""
    # rough per-row VMEM bytes: double-buffered IO + ~16 f32 (row,128) temporaries
    per_row = 4 * (2 * in_width + 2 * out_width + 16 * 128)
    budget = 16 * 1024 * 1024           # well under every chip's scoped default
    cap = max(8, min(max_block, budget // per_row))
    cap = (cap // 8) * 8
    if Bp <= 8:
        return Bp
    cap = min(cap, Bp // 2)             # >=2 parallel steps across TensorCores
    best = 8
    for cand in range(8, cap + 1, 8):
        if Bp % cand == 0:
            best = cand
    return best


def gmvae_forward(x, params, z_dim, y_dim, temperature=1.0, *, noise_key=None):
    B = x.shape[0]
    x_flat = x.reshape(B, -1).astype(jnp.float32)          # x.view(x.size(0), -1)
    x_dim = x_flat.shape[1]
    hid = _HIDDEN

    if noise_key is None:
        noise_key = jax.random.PRNGKey(42)
    gumbel, eps = _make_noise(noise_key, B, z_dim, y_dim)

    # single lane-dense input slab: [x | gumbel | eps] -> one input DMA per step
    in_slab = jnp.concatenate([x_flat, gumbel, eps], axis=1)
    in_width = x_dim + y_dim + z_dim

    # 1/temperature as SMEM scalar: runtime data, no recompile, applied in-kernel
    inv_t = (1.0 / jnp.asarray(temperature, jnp.float32)).reshape(1)

    slab, layout = pack_params(params, x_dim, z_dim, y_dim)

    cols, total = _out_columns(z_dim, y_dim)
    out_width = ((total + 127) // 128) * 128                # lane-dense output slab

    # pad batch to a multiple of 8 so blocks tile cleanly and grid divides exactly
    Bp = max(_round8(B), 8)
    if Bp != B:
        in_slab = jnp.pad(in_slab, ((0, Bp - B), (0, 0)))

    block_b = _choose_batch_block(Bp, in_width, out_width)
    grid = (Bp // block_b,)

    flops = 2 * Bp * (x_dim * 2 * hid + hid * y_dim + y_dim * (hid + 2 * z_dim)
                      + hid * 2 * z_dim + z_dim * hid + hid * hid
                      + hid * 2 * hid + 2 * hid * 7)
    transcendentals = Bp * (2 * y_dim + 2 * z_dim + hid + z_dim + 8)
    bytes_accessed = (2 * layout["rows"] * 128
                      + 4 * Bp * (in_width + out_width) + 4)

    kernel = functools.partial(gmvae_kernel, layout, (x_dim, z_dim, y_dim, hid))

    packed_out = pl.pallas_call(
        kernel,
        out_shape=jax.ShapeDtypeStruct((Bp, out_width), jnp.float32),
        grid=grid,
        in_specs=[
            pl.BlockSpec((block_b, in_width), lambda i: (i, 0)),       # [x|gumbel|eps]
            pl.BlockSpec(memory_space=pltpu.MemorySpace.SMEM),         # 1/T scalar
            pl.BlockSpec((layout["rows"], 128), lambda i: (0, 0)),     # bf16 params
        ],
        out_specs=pl.BlockSpec((block_b, out_width), lambda i: (i, 0)),
        compiler_params=pltpu.CompilerParams(
            dimension_semantics=("parallel",)),
        cost_estimate=pl.CostEstimate(
            flops=int(flops),
            transcendentals=int(transcendentals),
            bytes_accessed=int(bytes_accessed)),
    )(in_slab, inv_t, slab)

    return {name: packed_out[:B, a:b] for name, (a, b) in cols.items()}


# ------------------------- pure-JAX reference (check) -----------------------

def _reference_forward(x_flat, params, gumbel, eps, temperature):
    relu = lambda a: jnp.maximum(a, 0.0)
    softplus = lambda a: jnp.where(a > 20.0, a, jnp.log1p(jnp.exp(jnp.minimum(a, 20.0))))

    h = relu(x_flat @ params["w_qyx1"] + params["b_qyx1"])
    logits = h @ params["w_lg"] + params["b_lg"]
    prob = jax.nn.softmax(logits, axis=-1)
    y = jax.nn.softmax((logits + gumbel) / temperature, axis=-1)

    cat = jnp.concatenate([x_flat, y], axis=1)
    h2 = relu(cat @ params["w_qz1"] + params["b_qz1"])
    mu = h2 @ params["w_mu"] + params["b_mu"]
    var = softplus(h2 @ params["w_var"] + params["b_var"])
    z = mu + eps * jnp.sqrt(var + 1e-10)

    y_mu = y @ params["w_ymu"] + params["b_ymu"]
    y_var = softplus(y @ params["w_yvar"] + params["b_yvar"])

    g1 = relu(z @ params["w_g1"] + params["b_g1"])
    x_f = jax.nn.sigmoid(g1 @ params["w_g2"] + params["b_g2"])

    force = jax.nn.sigmoid(
        relu(x_f @ params["w_f1"] + params["b_f1"]) @ params["w_f2"] + params["b_f2"])
    rot = relu(x_f @ params["w_r1"] + params["b_r1"]) @ params["w_r2"] + params["b_r2"]
    rot = rot / jnp.maximum(
        jnp.sqrt(jnp.sum(rot * rot, axis=1, keepdims=True)), 1e-12)

    return {"mean": mu, "var": var, "gaussian": z, "logits": logits,
            "prob_cat": prob, "categorical": y, "y_mean": y_mu, "y_var": y_var,
            "rot": rot, "force": force}


# --------------------------------- main ------------------------------------

if __name__ == "__main__":
    # small shapes: batch=8, NCHW input (8, 2, 4, 4) -> x_dim = 32
    B, C, H, W = 8, 2, 4, 4
    x_dim, z_dim, y_dim = C * H * W, 16, 8
    temperature = 1.0

    root = jax.random.PRNGKey(0)
    k_x, k_p, k_noise = jax.random.split(root, 3)

    x = jax.random.normal(k_x, (B, C, H, W), jnp.float32)
    params = init_params(k_p, x_dim, z_dim, y_dim)

    out = gmvae_forward(x, params, z_dim, y_dim, temperature, noise_key=k_noise)
    out = jax.block_until_ready(out)

    # shape sanity
    assert out["gaussian"].shape == (B, z_dim)
    assert out["prob_cat"].shape == (B, y_dim)
    assert out["rot"].shape == (B, 4)
    assert out["force"].shape == (B, 3)

    # numeric parity against a pure-JAX f32 reference using the same noise.
    # Tolerance covers bf16 MXU operands (f32 accumulation) in the kernel.
    gumbel, eps = _make_noise(k_noise, B, z_dim, y_dim)
    ref = _reference_forward(x.reshape(B, -1), params, gumbel, eps, temperature)
    for k in _OUT_ORDER:
        a, b = np.asarray(out[k]), np.asarray(ref[k])
        assert a.shape == b.shape, (k, a.shape, b.shape)
        assert np.allclose(a, b, rtol=5e-2, atol=3e-2), (k, np.max(np.abs(a - b)))

    print("KERNEL_OK")
</pallas_src>

<mosaic_0001>
module attributes {stable_mosaic.version = 11 : i64} {
  func.func @gmvae_kernel(%arg0: i32, %arg1: memref<8x56xf32, #tpu.memory_space<vmem>>, %arg2: memref<1xf32, #tpu.memory_space<smem>>, %arg3: memref<464x128xbf16, #tpu.memory_space<vmem>>, %arg4: memref<8x128xf32, #tpu.memory_space<vmem>>) attributes {dimension_semantics = [#tpu.dimension_semantics<parallel>], iteration_bounds = array<i64: 1>, scalar_prefetch = 0 : i64, scratch_operands = 0 : i64, tpu.core_type = #tpu.core_type<tc>, window_params = [{transform_indices = @transform_0, window_bounds = array<i64: 8, 56>}, {transform_indices = @transform_1, window_bounds = array<i64: 1>}, {pipeline_mode = #tpu.pipeline_mode<synchronous>, transform_indices = @transform_2, window_bounds = array<i64: 464, 128>}, {transform_indices = @transform_3, window_bounds = array<i64: 8, 128>}]} {
    %c0 = arith.constant 0 : index
    %0 = memref.load %arg2[%c0] : memref<1xf32, #tpu.memory_space<smem>>
    %c0_0 = arith.constant 0 : index
    %c0_1 = arith.constant 0 : index
    %1 = vector.load %arg1[%c0_0, %c0_1] : memref<8x56xf32, #tpu.memory_space<vmem>>, vector<8x56xf32>
    %2 = vector.extract_strided_slice %1 {offsets = [0, 0], sizes = [8, 32], strides = [1, 1]} : vector<8x56xf32> to vector<8x32xf32>
    %3 = vector.extract_strided_slice %1 {offsets = [0, 32], sizes = [8, 8], strides = [1, 1]} : vector<8x56xf32> to vector<8x8xf32>
    %4 = vector.extract_strided_slice %1 {offsets = [0, 40], sizes = [8, 16], strides = [1, 1]} : vector<8x56xf32> to vector<8x16xf32>
    %5 = arith.truncf %2 : vector<8x32xf32> to vector<8x32xbf16>
    %c0_2 = arith.constant 0 : index
    %c0_3 = arith.constant 0 : index
    %6 = vector.load %arg3[%c0_2, %c0_3] : memref<464x128xbf16, #tpu.memory_space<vmem>>, vector<32x128xbf16>
    %cst = arith.constant dense<0.000000e+00> : vector<8x128xf32>
    %7 = tpu.matmul %5, %6, %cst {dimension_numbers = #tpu.dot_dimension_numbers<[1], [0], [0], [1], [0, 0, 1, 1], [], []>} : vector<8x32xbf16>, vector<32x128xbf16>, vector<8x128xf32> -> vector<8x128xf32>
    %8 = vector.extract_strided_slice %7 {offsets = [0, 0], sizes = [8, 64], strides = [1, 1]} : vector<8x128xf32> to vector<8x64xf32>
    %c448 = arith.constant 448 : index
    %c0_4 = arith.constant 0 : index
    %9 = vector.load %arg3[%c448, %c0_4] : memref<464x128xbf16, #tpu.memory_space<vmem>>, vector<1x64xbf16>
    %10 = arith.extf %9 : vector<1x64xbf16> to vector<1x64xf32>
    %11 = vector.broadcast %10 : vector<1x64xf32> to vector<8x64xf32>
    %12 = arith.addf %8, %11 : vector<8x64xf32>
    %cst_5 = arith.constant 0.000000e+00 : f32
    %13 = vector.broadcast %cst_5 : f32 to vector<8x64xf32>
    %14 = arith.maximumf %12, %13 : vector<8x64xf32>
    %15 = vector.extract_strided_slice %7 {offsets = [0, 64], sizes = [8, 64], strides = [1, 1]} : vector<8x128xf32> to vector<8x64xf32>
    %16 = arith.truncf %14 : vector<8x64xf32> to vector<8x64xbf16>
    %c32 = arith.constant 32 : index
    %c0_6 = arith.constant 0 : index
    %17 = vector.load %arg3[%c32, %c0_6] : memref<464x128xbf16, #tpu.memory_space<vmem>>, vector<64x8xbf16>
    %cst_7 = arith.constant dense<0.000000e+00> : vector<8x8xf32>
    %18 = tpu.matmul %16, %17, %cst_7 {dimension_numbers = #tpu.dot_dimension_numbers<[1], [0], [0], [1], [0, 0, 1, 1], [], []>} : vector<8x64xbf16>, vector<64x8xbf16>, vector<8x8xf32> -> vector<8x8xf32>
    %c449 = arith.constant 449 : index
    %c0_8 = arith.constant 0 : index
    %19 = vector.load %arg3[%c449, %c0_8] : memref<464x128xbf16, #tpu.memory_space<vmem>>, vector<1x8xbf16>
    %20 = arith.extf %19 : vector<1x8xbf16> to vector<1x8xf32>
    %21 = vector.broadcast %20 : vector<1x8xf32> to vector<8x8xf32>
    %22 = arith.addf %18, %21 : vector<8x8xf32>
    %cst_9 = arith.constant dense<0xFF800000> : vector<8xf32>
    %23 = vector.multi_reduction <maximumf>, %22, %cst_9 [1] : vector<8x8xf32> to vector<8xf32>
    %24 = vector.shape_cast %23 : vector<8xf32> to vector<8x1xf32>
    %25 = vector.broadcast %24 : vector<8x1xf32> to vector<8x8xf32>
    %26 = arith.subf %22, %25 : vector<8x8xf32>
    %27 = math.exp %26 : vector<8x8xf32>
    %cst_10 = arith.constant dense<0.000000e+00> : vector<8xf32>
    %28 = vector.multi_reduction <add>, %27, %cst_10 [1] : vector<8x8xf32> to vector<8xf32>
    %29 = vector.shape_cast %28 : vector<8xf32> to vector<8x1xf32>
    %30 = vector.broadcast %29 : vector<8x1xf32> to vector<8x8xf32>
    %31 = arith.divf %27, %30 : vector<8x8xf32>
    %32 = arith.addf %22, %3 : vector<8x8xf32>
    %33 = vector.broadcast %0 : f32 to vector<8x8xf32>
    %34 = arith.mulf %32, %33 : vector<8x8xf32>
    %cst_11 = arith.constant dense<0xFF800000> : vector<8xf32>
    %35 = vector.multi_reduction <maximumf>, %34, %cst_11 [1] : vector<8x8xf32> to vector<8xf32>
    %36 = vector.shape_cast %35 : vector<8xf32> to vector<8x1xf32>
    %37 = vector.broadcast %36 : vector<8x1xf32> to vector<8x8xf32>
    %38 = arith.subf %34, %37 : vector<8x8xf32>
    %39 = math.exp %38 : vector<8x8xf32>
    %cst_12 = arith.constant dense<0.000000e+00> : vector<8xf32>
    %40 = vector.multi_reduction <add>, %39, %cst_12 [1] : vector<8x8xf32> to vector<8xf32>
    %41 = vector.shape_cast %40 : vector<8xf32> to vector<8x1xf32>
    %42 = vector.broadcast %41 : vector<8x1xf32> to vector<8x8xf32>
    %43 = arith.divf %39, %42 : vector<8x8xf32>
    %44 = arith.truncf %43 : vector<8x8xf32> to vector<8x8xbf16>
    %c96 = arith.constant 96 : index
    %c0_13 = arith.constant 0 : index
    %45 = vector.load %arg3[%c96, %c0_13] : memref<464x128xbf16, #tpu.memory_space<vmem>>, vector<8x96xbf16>
    %cst_14 = arith.constant dense<0.000000e+00> : vector<8x96xf32>
    %46 = tpu.matmul %44, %45, %cst_14 {dimension_numbers = #tpu.dot_dimension_numbers<[1], [0], [0], [1], [0, 0, 1, 1], [], []>} : vector<8x8xbf16>, vector<8x96xbf16>, vector<8x96xf32> -> vector<8x96xf32>
    %47 = vector.extract_strided_slice %46 {offsets = [0, 0], sizes = [8, 64], strides = [1, 1]} : vector<8x96xf32> to vector<8x64xf32>
    %48 = arith.addf %15, %47 : vector<8x64xf32>
    %c450 = arith.constant 450 : index
    %c0_15 = arith.constant 0 : index
    %49 = vector.load %arg3[%c450, %c0_15] : memref<464x128xbf16, #tpu.memory_space<vmem>>, vector<1x64xbf16>
    %50 = arith.extf %49 : vector<1x64xbf16> to vector<1x64xf32>
    %51 = vector.broadcast %50 : vector<1x64xf32> to vector<8x64xf32>
    %52 = arith.addf %48, %51 : vector<8x64xf32>
    %cst_16 = arith.constant 0.000000e+00 : f32
    %53 = vector.broadcast %cst_16 : f32 to vector<8x64xf32>
    %54 = arith.maximumf %52, %53 : vector<8x64xf32>
    %55 = vector.extract_strided_slice %46 {offsets = [0, 64], sizes = [8, 32], strides = [1, 1]} : vector<8x96xf32> to vector<8x32xf32>
    %c452 = arith.constant 452 : index
    %c0_17 = arith.constant 0 : index
    %56 = vector.load %arg3[%c452, %c0_17] : memref<464x128xbf16, #tpu.memory_space<vmem>>, vector<1x32xbf16>
    %57 = arith.extf %56 : vector<1x32xbf16> to vector<1x32xf32>
    %58 = vector.broadcast %57 : vector<1x32xf32> to vector<8x32xf32>
    %59 = arith.addf %55, %58 : vector<8x32xf32>
    %60 = vector.extract_strided_slice %59 {offsets = [0, 0], sizes = [8, 16], strides = [1, 1]} : vector<8x32xf32> to vector<8x16xf32>
    %61 = vector.extract_strided_slice %59 {offsets = [0, 16], sizes = [8, 16], strides = [1, 1]} : vector<8x32xf32> to vector<8x16xf32>
    %cst_18 = arith.constant 2.000000e+01 : f32
    %62 = vector.broadcast %cst_18 : f32 to vector<8x16xf32>
    %63 = arith.cmpf ogt, %61, %62 : vector<8x16xf32>
    %cst_19 = arith.constant 2.000000e+01 : f32
    %64 = vector.broadcast %cst_19 : f32 to vector<8x16xf32>
    %65 = arith.minimumf %61, %64 : vector<8x16xf32>
    %66 = math.exp %65 : vector<8x16xf32>
    %67 = math.log1p %66 : vector<8x16xf32>
    %68 = arith.select %63, %61, %67 : vector<8x16xi1>, vector<8x16xf32>
    %69 = arith.truncf %54 : vector<8x64xf32> to vector<8x64xbf16>
    %c112 = arith.constant 112 : index
    %c0_20 = arith.constant 0 : index
    %70 = vector.load %arg3[%c112, %c0_20] : memref<464x128xbf16, #tpu.memory_space<vmem>>, vector<64x32xbf16>
    %cst_21 = arith.constant dense<0.000000e+00> : vector<8x32xf32>
    %71 = tpu.matmul %69, %70, %cst_21 {dimension_numbers = #tpu.dot_dimension_numbers<[1], [0], [0], [1], [0, 0, 1, 1], [], []>} : vector<8x64xbf16>, vector<64x32xbf16>, vector<8x32xf32> -> vector<8x32xf32>
    %c451 = arith.constant 451 : index
    %c0_22 = arith.constant 0 : index
    %72 = vector.load %arg3[%c451, %c0_22] : memref<464x128xbf16, #tpu.memory_space<vmem>>, vector<1x32xbf16>
    %73 = arith.extf %72 : vector<1x32xbf16> to vector<1x32xf32>
    %74 = vector.broadcast %73 : vector<1x32xf32> to vector<8x32xf32>
    %75 = arith.addf %71, %74 : vector<8x32xf32>
    %76 = vector.extract_strided_slice %75 {offsets = [0, 0], sizes = [8, 16], strides = [1, 1]} : vector<8x32xf32> to vector<8x16xf32>
    %77 = vector.extract_strided_slice %75 {offsets = [0, 16], sizes = [8, 16], strides = [1, 1]} : vector<8x32xf32> to vector<8x16xf32>
    %cst_23 = arith.constant 2.000000e+01 : f32
    %78 = vector.broadcast %cst_23 : f32 to vector<8x16xf32>
    %79 = arith.cmpf ogt, %77, %78 : vector<8x16xf32>
    %cst_24 = arith.constant 2.000000e+01 : f32
    %80 = vector.broadcast %cst_24 : f32 to vector<8x16xf32>
    %81 = arith.minimumf %77, %80 : vector<8x16xf32>
    %82 = math.exp %81 : vector<8x16xf32>
    %83 = math.log1p %82 : vector<8x16xf32>
    %84 = arith.select %79, %77, %83 : vector<8x16xi1>, vector<8x16xf32>
    %cst_25 = arith.constant 1.000000e-10 : f32
    %85 = vector.broadcast %cst_25 : f32 to vector<8x16xf32>
    %86 = arith.addf %84, %85 : vector<8x16xf32>
    %87 = math.sqrt %86 : vector<8x16xf32>
    %88 = arith.mulf %4, %87 : vector<8x16xf32>
    %89 = arith.addf %76, %88 : vector<8x16xf32>
    %90 = arith.truncf %89 : vector<8x16xf32> to vector<8x16xbf16>
    %c176 = arith.constant 176 : index
    %c0_26 = arith.constant 0 : index
    %91 = vector.load %arg3[%c176, %c0_26] : memref<464x128xbf16, #tpu.memory_space<vmem>>, vector<16x64xbf16>
    %cst_27 = arith.constant dense<0.000000e+00> : vector<8x64xf32>
    %92 = tpu.matmul %90, %91, %cst_27 {dimension_numbers = #tpu.dot_dimension_numbers<[1], [0], [0], [1], [0, 0, 1, 1], [], []>} : vector<8x16xbf16>, vector<16x64xbf16>, vector<8x64xf32> -> vector<8x64xf32>
    %c453 = arith.constant 453 : index
    %c0_28 = arith.constant 0 : index
    %93 = vector.load %arg3[%c453, %c0_28] : memref<464x128xbf16, #tpu.memory_space<vmem>>, vector<1x64xbf16>
    %94 = arith.extf %93 : vector<1x64xbf16> to vector<1x64xf32>
    %95 = vector.broadcast %94 : vector<1x64xf32> to vector<8x64xf32>
    %96 = arith.addf %92, %95 : vector<8x64xf32>
    %cst_29 = arith.constant 0.000000e+00 : f32
    %97 = vector.broadcast %cst_29 : f32 to vector<8x64xf32>
    %98 = arith.maximumf %96, %97 : vector<8x64xf32>
    %99 = arith.truncf %98 : vector<8x64xf32> to vector<8x64xbf16>
    %c192 = arith.constant 192 : index
    %c0_30 = arith.constant 0 : index
    %100 = vector.load %arg3[%c192, %c0_30] : memref<464x128xbf16, #tpu.memory_space<vmem>>, vector<64x64xbf16>
    %cst_31 = arith.constant dense<0.000000e+00> : vector<8x64xf32>
    %101 = tpu.matmul %99, %100, %cst_31 {dimension_numbers = #tpu.dot_dimension_numbers<[1], [0], [0], [1], [0, 0, 1, 1], [], []>} : vector<8x64xbf16>, vector<64x64xbf16>, vector<8x64xf32> -> vector<8x64xf32>
    %c454 = arith.constant 454 : index
    %c0_32 = arith.constant 0 : index
    %102 = vector.load %arg3[%c454, %c0_32] : memref<464x128xbf16, #tpu.memory_space<vmem>>, vector<1x64xbf16>
    %103 = arith.extf %102 : vector<1x64xbf16> to vector<1x64xf32>
    %104 = vector.broadcast %103 : vector<1x64xf32> to vector<8x64xf32>
    %105 = arith.addf %101, %104 : vector<8x64xf32>
    %cst_33 = arith.constant 5.000000e-01 : f32
    %106 = vector.broadcast %cst_33 : f32 to vector<8x64xf32>
    %107 = arith.mulf %106, %105 : vector<8x64xf32>
    %108 = math.tanh %107 : vector<8x64xf32>
    %cst_34 = arith.constant 5.000000e-01 : f32
    %109 = vector.broadcast %cst_34 : f32 to vector<8x64xf32>
    %110 = arith.mulf %109, %108 : vector<8x64xf32>
    %cst_35 = arith.constant 5.000000e-01 : f32
    %111 = vector.broadcast %cst_35 : f32 to vector<8x64xf32>
    %112 = arith.addf %110, %111 : vector<8x64xf32>
    %113 = arith.truncf %112 : vector<8x64xf32> to vector<8x64xbf16>
    %c256 = arith.constant 256 : index
    %c0_36 = arith.constant 0 : index
    %114 = vector.load %arg3[%c256, %c0_36] : memref<464x128xbf16, #tpu.memory_space<vmem>>, vector<64x128xbf16>
    %cst_37 = arith.constant dense<0.000000e+00> : vector<8x128xf32>
    %115 = tpu.matmul %113, %114, %cst_37 {dimension_numbers = #tpu.dot_dimension_numbers<[1], [0], [0], [1], [0, 0, 1, 1], [], []>} : vector<8x64xbf16>, vector<64x128xbf16>, vector<8x128xf32> -> vector<8x128xf32>
    %c455 = arith.constant 455 : index
    %c0_38 = arith.constant 0 : index
    %116 = vector.load %arg3[%c455, %c0_38] : memref<464x128xbf16, #tpu.memory_space<vmem>>, vector<1x128xbf16>
    %117 = arith.extf %116 : vector<1x128xbf16> to vector<1x128xf32>
    %118 = vector.broadcast %117 : vector<1x128xf32> to vector<8x128xf32>
    %119 = arith.addf %115, %118 : vector<8x128xf32>
    %cst_39 = arith.constant 0.000000e+00 : f32
    %120 = vector.broadcast %cst_39 : f32 to vector<8x128xf32>
    %121 = arith.maximumf %119, %120 : vector<8x128xf32>
    %122 = arith.truncf %121 : vector<8x128xf32> to vector<8x128xbf16>
    %c320 = arith.constant 320 : index
    %c0_40 = arith.constant 0 : index
    %123 = vector.load %arg3[%c320, %c0_40] : memref<464x128xbf16, #tpu.memory_space<vmem>>, vector<128x7xbf16>
    %cst_41 = arith.constant dense<0.000000e+00> : vector<8x7xf32>
    %124 = tpu.matmul %122, %123, %cst_41 {dimension_numbers = #tpu.dot_dimension_numbers<[1], [0], [0], [1], [0, 0, 1, 1], [], []>} : vector<8x128xbf16>, vector<128x7xbf16>, vector<8x7xf32> -> vector<8x7xf32>
    %c456 = arith.constant 456 : index
    %c0_42 = arith.constant 0 : index
    %125 = vector.load %arg3[%c456, %c0_42] : memref<464x128xbf16, #tpu.memory_space<vmem>>, vector<1x7xbf16>
    %126 = arith.extf %125 : vector<1x7xbf16> to vector<1x7xf32>
    %127 = vector.broadcast %126 : vector<1x7xf32> to vector<8x7xf32>
    %128 = arith.addf %124, %127 : vector<8x7xf32>
    %129 = vector.extract_strided_slice %128 {offsets = [0, 0], sizes = [8, 3], strides = [1, 1]} : vector<8x7xf32> to vector<8x3xf32>
    %cst_43 = arith.constant 5.000000e-01 : f32
    %130 = vector.broadcast %cst_43 : f32 to vector<8x3xf32>
    %131 = arith.mulf %130, %129 : vector<8x3xf32>
    %132 = math.tanh %131 : vector<8x3xf32>
    %cst_44 = arith.constant 5.000000e-01 : f32
    %133 = vector.broadcast %cst_44 : f32 to vector<8x3xf32>
    %134 = arith.mulf %133, %132 : vector<8x3xf32>
    %cst_45 = arith.constant 5.000000e-01 : f32
    %135 = vector.broadcast %cst_45 : f32 to vector<8x3xf32>
    %136 = arith.addf %134, %135 : vector<8x3xf32>
    %137 = vector.extract_strided_slice %128 {offsets = [0, 3], sizes = [8, 4], strides = [1, 1]} : vector<8x7xf32> to vector<8x4xf32>
    %138 = arith.mulf %137, %137 : vector<8x4xf32>
    %cst_46 = arith.constant dense<0.000000e+00> : vector<8xf32>
    %139 = vector.multi_reduction <add>, %138, %cst_46 [1] : vector<8x4xf32> to vector<8xf32>
    %140 = vector.shape_cast %139 : vector<8xf32> to vector<8x1xf32>
    %cst_47 = arith.constant 1.000000e-24 : f32
    %141 = vector.broadcast %cst_47 : f32 to vector<8x1xf32>
    %142 = arith.maximumf %140, %141 : vector<8x1xf32>
    %143 = math.rsqrt %142 : vector<8x1xf32>
    %144 = vector.broadcast %143 : vector<8x1xf32> to vector<8x4xf32>
    %145 = arith.mulf %137, %144 : vector<8x4xf32>
    %cst_48 = arith.constant 0.000000e+00 : f32
    %146 = vector.broadcast %cst_48 : f32 to vector<8x17xf32>
    %147 = tpu.concatenate %76, %84, %89, %60, %68, %22, %31, %43, %145, %136, %146 in 1 : vector<8x16xf32>, vector<8x16xf32>, vector<8x16xf32>, vector<8x16xf32>, vector<8x16xf32>, vector<8x8xf32>, vector<8x8xf32>, vector<8x8xf32>, vector<8x4xf32>, vector<8x3xf32>, vector<8x17xf32> -> vector<8x128xf32>
    %c0_49 = arith.constant 0 : index
    %c0_50 = arith.constant 0 : index
    %148 = vector.load %arg4[%c0_49, %c0_50] : memref<8x128xf32, #tpu.memory_space<vmem>>, vector<8x128xf32>
    tpu.vector_store %arg4[%c0_49, %c0_50], %147 {strides = array<i32>} : memref<8x128xf32, #tpu.memory_space<vmem>>, vector<8x128xf32>,
    return
  }
  func.func @transform_0(%arg0: i32) -> (i32, i32) {
    %c0_i32 = arith.constant 0 : i32
    %c0_i32_0 = arith.constant 0 : i32
    return %arg0, %c0_i32 : i32, i32
  }
  func.func @transform_1(%arg0: i32) -> i32 {
    %c0_i32 = arith.constant 0 : i32
    %c0_i32_0 = arith.constant 0 : i32
    return %c0_i32 : i32
  }
  func.func @transform_2(%arg0: i32) -> (i32, i32) {
    %c0_i32 = arith.constant 0 : i32
    %c0_i32_0 = arith.constant 0 : i32
    %c0_i32_1 = arith.constant 0 : i32
    return %c0_i32, %c0_i32_0 : i32, i32
  }
  func.func @transform_3(%arg0: i32) -> (i32, i32) {
    %c0_i32 = arith.constant 0 : i32
    %c0_i32_0 = arith.constant 0 : i32
    return %arg0, %c0_i32 : i32, i32
  }
}

</mosaic_0001>

<bundles_post_ra>
// kernel: tpu_custom_call.1
= control target key start
LH: loop header
LB: loop body
LE: loop exit
PB: predicated region body
PF: predicated region fallthrough
CT: control target
= control target key end

     0   :  { %9 = vsyncpa [#allocation4], 0  ;;  %s1358_s0 = inlined_call_operand.hbm [shape: f32[8,56], index: 0, kind: input, shape index: {}]   ;;  %s1359_s1 = inlined_call_operand.<no memory space> [shape: f32[1], index: 1, kind: input, shape index: {}]   ;;  %s1360_s2 = inlined_call_operand.hbm [shape: bf16[464,128], index: 2, kind: input, shape index: {}]   ;;  %s1361_s3 = inlined_call_operand.hbm [shape: f32[8,128], index: 3, kind: output, shape index: {}]  }
   0x1   :  { %10 = vsyncpa [#allocation7], 0 }
   0x2   :  { %11 = vsyncpa [#allocation5], 0  ;;  %s1146_s12 = smov [#allocation3]   ;;  %s1147_s14 = smov [#allocation6]  }
   0x3   :  { %s18_s13 = sshll.u32 %s1146_s12, 4  ;;  %s29_s15 = sshll.u32 %s1147_s14, 4  ;;  %s19_s13 = int_to_ptr.vmem [resolvable:$true] %s18_s13  ;;  %s1182_s15 = int_to_ptr.vmem [resolvable:$true] %s29_s15 }
   0x4   :  { %s1074_s18 = scalar_lea.hbm %s1358_s0, 128 }
   0x5   :  { %p1075_p0 = scmp.ne.s32.totalorder %s1358_s0, %s1074_s18  ;;  %p1078_p1 = scmp.lt.u32.totalorder %s1074_s18, %s1358_s0 }
   0x7   :  { %p1080_p2 = pnand %p1078_p1, %p1075_p0 }
   0x9   :  { %1083 = shalt.err (!%p1080_p2)
}
   0xa   :  { %s1084_s23 = scalar_lea.vmem %s19_s13, 128  ;;  %p1089_p4 = scmp.lt.s32.totalorder %s19_s13, %s19_s13 }
   0xb   :  { %p1085_p3 = scmp.ne.s32.totalorder %s19_s13, %s1084_s23  ;;  %p1090_p5 = scmp.lt.s32.totalorder %s1084_s23, %s1084_s23 }
   0xd   :  { %p1091_p6 = por %p1090_p5, %p1089_p4 }
   0xf   :  { %p1092_p7 = pnand %p1091_p6, %p1085_p3 }
  0x11   :  { %1095 = shalt.err (!%p1092_p7)
}
  0x12   :  { %21 = dma.hbm_to_vmem [thread:$0]  %s1358_s0, 128, %s19_s13, [#allocation4]  }
  0x13   :  { %s1096_s28 = scalar_lea.hbm %s1360_s2, 3712 }
  0x14   :  { %p1097_p8 = scmp.ne.s32.totalorder %s1360_s2, %s1096_s28  ;;  %p1100_p9 = scmp.lt.u32.totalorder %s1096_s28, %s1360_s2 }
  0x16   :  { %p1102_p10 = pnand %p1100_p9, %p1097_p8 }
  0x18   :  { %1105 = shalt.err (!%p1102_p10)
}
  0x19   :  { %s1106_s6 = scalar_lea.vmem %s1182_s15, 3712  ;;  %p1111_p12 = scmp.lt.s32.totalorder %s1182_s15, %s1182_s15 }
  0x1a   :  { %p1107_p11 = scmp.ne.s32.totalorder %s1182_s15, %s1106_s6  ;;  %p1112_p13 = scmp.lt.s32.totalorder %s1106_s6, %s1106_s6 }
  0x1c   :  { %p1113_p0 = por %p1112_p13, %p1111_p12 }
  0x1e   :  { %p1114_p1 = pnand %p1113_p0, %p1107_p11 }
  0x20   :  { %1117 = shalt.err (!%p1114_p1)
}
  0x21   :  { %s1148_s0 = smov 64   ;;  %s1149_s7 = smov 4  }
  0x22   :  { %35 = dma.hbm_to_vmem [thread:$0]  %s1360_s2, 3712, %s1182_s15, [#allocation7], %s1148_s0, %s1148_s0, %s1149_s7  }
  0x23   :  { %1140 = dma.done.wait [#allocation4], 128  }
  0x24   :  { %1141 = vsyncadd [#allocation4], 4294967168 }
  0x25   :  { %1142 = dma.done.wait [#allocation7], 3712  }
  0x26   :  { %1143 = vsyncadd [#allocation7], 4294963584  ;;  %v1150_v0 = vmov 0.0   ;;  %vm1151_vm0 = vmmov 0   ;;  %v1023_v1 = vld [vmem:[#allocation6] sm:$0xff]   ;;  %v1024_v2 = vld [vmem:[#allocation6 + $0x8] sm:$0xff]   ;;  %v108_v9 = vlaneseq  ;;  %v212_v29 = vstv %s1359_s1 }
  0x27   :  { %919 = vmatprep.subr.bf16.mxu0 %v1150_v0  ;;  %923 = vmatprep.mubr.msk.bf16.mxu0 %vm1151_vm0, %v1150_v0  ;;  %v1221_v3 = vld [vmem:[#allocation3] sm:$0xff]  ;;  %vm62_vm1 = vcmask 261120   ;;  %v1025_v4 = vld [vmem:[#allocation6 + $0x10] sm:$0xff]   ;;  %v1027_v7 = vld [vmem:[#allocation6 + $0x20] sm:$0xff]   ;;  %s1152_s2 = smov 96   ;;  %vm151_vm2 = vcmask 523264  }
  0x28   :  { %939 = vmatprep.subr.bf16.mxu1 %v1150_v0  ;;  %941 = vmatprep.mubr.msk.bf16.mxu1 %vm1151_vm0, %v1150_v0  ;;  %v45_v5 = vpack.c.bf16 %v1221_v3, %v1221_v3  ;;  %v1026_v6 = vld [vmem:[#allocation6 + $0x18] sm:$0xff]   ;;  %v1028_v8 = vld [vmem:[#allocation6 + $0x28] sm:$0xff]   ;;  %v1236_v10 = vshrl.u32 %v108_v9, 7  ;;  %v106_v11 = vld [vmem:[#allocation6 + $0xe0] sm:$0x1]  ;;  %vm195_vm3 = vcmask 64512  }
  0x29   :  { %920 = vmatpush3.bf16.msra.mxu0 %v1023_v1  ;;  %208 = vrot.lane.b32.xlu0 %v1221_v3, %s1152_s2  ;;  %v107_v12 = vunpack.c.l.bf16 %v106_v11  ;;  %v226_v40 = vld [vmem:[#allocation6 + $0x30] sm:$0xf]  ;;  %vm230_vm4 = vcmask 1043456   ;;  %v1259_v42 = vld [vmem:[#allocation6 + $0xe0] sm:$0x4]  ;;  %v1029_v53 = vld [vmem:[#allocation6 + $0x38] sm:$0xff]  }
  0x2a   :  { %921 = vmatprep.subr.bf16.mxu0 %v1150_v0  ;;  %v110_v13 = vsub.s32 0, %v1236_v10  ;;  %v125_v22 = vsub.s32 1, %v1236_v10  ;;  %v232_v41 = vsel %vm230_vm4, %v226_v40, 0  ;;  %v295_v43 = vsub.s32 4, %v1236_v10  ;;  %v279_v50 = vld [vmem:[#allocation6 + $0xe0] sm:$0x2] }
  0x2b   :  { %940 = vmatpush3.bf16.msra.mxu1 %v232_v41  ;;  %v292_v44 = vunpack.c.l.bf16 %v1259_v42  ;;  %v280_v51 = vunpack.c.l.bf16 %v279_v50  ;;  %v283_v52 = vsub.s32 2, %v1236_v10  ;;  %v1030_v55 = vld [vmem:[#allocation6 + $0x40] sm:$0xff]   ;;  %v1031_v60 = vld [vmem:[#allocation6 + $0x48] sm:$0xff]   ;;  %v1032_v61 = vld [vmem:[#allocation6 + $0x50] sm:$0xff]   ;;  %s1153_s1 = smov 24   ;;  %s1154_s12 = smov 88  }
  0x2c   :  { %v111_v14 = vrot.slane %v107_v12, %v110_v13  ;;  %v126_v23 = vrot.slane %v107_v12, %v125_v22  ;;  %957 = vmatprep.subr.bf16.mxu1 %v1150_v0  ;;  %v1034_v40 = vld [vmem:[#allocation6 + $0x60] sm:$0xff]   ;;  %vm444_vm9 = vcmask 130048   ;;  %v1040_v42 = vld [vmem:[#allocation6 + $0x90] sm:$0xff]   ;;  %s1155_s13 = smov 125   ;;  %s1156_s14 = smov 32   ;;  %vm776_vm12 = vcmask 31744  }
  0x2d   :  { %922 = vmatpush3.bf16.msra.mxu0 %v1024_v2  ;;  %v296_v45 = vrot.slane %v292_v44, %v295_v43  ;;  %v284_v57 = vrot.slane %v280_v51, %v283_v52  ;;  %v1035_v43 = vld [vmem:[#allocation6 + $0x68] sm:$0xff]   ;;  %s1157_s15 = smov 112   ;;  %s1158_s16 = smov 80   ;;  %vm817_vm13 = vcmask 392192   ;;  %vm820_vm14 = vcmask 654336  }
  0x2e   :  { %927 = vmatprep.subr.bf16.mxu0 %v1150_v0  ;;  %s1159_s17 = smov 108   ;;  %s1160_s18 = smov 101   ;;  %vm822_vm15 = vcmask 719872   ;;  %vm828_vm4 = vcmask 883712  }
  0x2f   :  { %s1161_s19 = smov [#allocation8]  }
  0x30   :  { %924 = vmatmul.mubr.msk.bf16.vlgmr.msra.gmra.mrb[0].mxu0 %vm62_vm1, %v45_v5  ;;  %s839_s20 = sshll.u32 %s1161_s19, 4  ;;  %s840_s20 = int_to_ptr.vmem [resolvable:$true] %s839_s20 }
  0x31   :  { %928 = vmatpush3.bf16.msra.mxu0 %v1025_v4  ;;  %935 = vmatprep.mubr.msk.bf16.mxu0 %vm1151_vm0, %v1150_v0  ;;  %s1118_s21 = scalar_lea.vmem %s840_s20, 128  ;;  %p1123_p3 = scmp.lt.s32.totalorder %s840_s20, %s840_s20 }
  0x32   :  { %929 = vmatprep.subr.bf16.mxu0 %v1150_v0  ;;  %p1119_p2 = scmp.ne.s32.totalorder %s840_s20, %s1118_s21  ;;  %p1124_p4 = scmp.lt.s32.totalorder %s1118_s21, %s1118_s21 }
  0x34   :  { %p1125_p5 = por %p1124_p4, %p1123_p3 }
  0x35   :  { %930 = vmatpush3.bf16.msra.mxu0 %v1026_v6 }
  0x36   :  { %931 = vmatprep.subr.bf16.mxu0 %v1150_v0  ;;  %p1126_p6 = pnand %p1125_p5, %p1119_p2 }
  0x39   :  { %932 = vmatpush3.bf16.msra.mxu0 %v1027_v7  ;;  %v327_v7 = vsub.s32 3, %v1236_v10 }
  0x3a   :  { %933 = vmatprep.subr.bf16.mxu0 %v1150_v0 }
  0x3d   :  { %934 = vmatpush3.bf16.msra.mxu0 %v1028_v8  ;;  %v328_v8 = vrot.slane %v280_v51, %v327_v7 }
  0x3e   :  { %945 = vmatprep.subr.bf16.mxu0 %v1150_v0 }
  0x9b   :  { %v209_v25 = vpop.permute.xlu0 %208 }
 0x103   :  { %v1241_v15 = vpop.f32.mrb[0].mxu0 }
 0x104   :  { %v112_v16 = vadd.f32 %v111_v14, %v1241_v15  ;;  %v925_v17 = vpop.f32.mrb[1].mxu0 }
 0x105   :  { %v103_v18 = vpop.f32.mrb[2].mxu0 }
 0x106   :  { %v113_v19 = vmax.f32 %v112_v16, 0.0  ;;  %v926_v20 = vpop.f32.mrb[3].mxu0 }
 0x108   :  { %v114_v21 = vpack.c.bf16 %v113_v19, %v113_v19 }
 0x10a   :  { %936 = vmatmul.mubr.msk.bf16.vlgmr.msra.gmra.mrb[4].mxu0 %vm151_vm2, %v114_v21 }
 0x10b   :  { %953 = vmatprep.mubr.msk.bf16.mxu0 %vm1151_vm0, %v1150_v0  ;;  %946 = vmatpush3.bf16.msra.mxu0 %v1029_v53 }
 0x10c   :  { %947 = vmatprep.subr.bf16.mxu0 %v1150_v0 }
 0x10f   :  { %948 = vmatpush3.bf16.msra.mxu0 %v1030_v55 }
 0x110   :  { %949 = vmatprep.subr.bf16.mxu0 %v1150_v0 }
 0x113   :  { %950 = vmatpush3.bf16.msra.mxu0 %v1031_v60  ;;  %v1043_v60 = vld [vmem:[#allocation6 + $0xa8] sm:$0xff]  }
 0x114   :  { %951 = vmatprep.subr.bf16.mxu0 %v1150_v0 }
 0x117   :  { %952 = vmatpush3.bf16.msra.mxu0 %v1032_v61  ;;  %v1044_v61 = vld [vmem:[#allocation6 + $0xb0] sm:$0xff]  }
 0x118   :  { %975 = vmatprep.subr.bf16.mxu0 %v1150_v0 }
 0x1dd   :  { %v189_v24 = vpop.f32.mrb[4].mxu0 }
 0x1de   :  { %v1248_v26 = vadd.f32 %v189_v24, %v126_v23  ;;  %v937_v27 = vpop.f32.mrb[5].mxu0 }
 0x1df   :  { %v192_v28 = vpop.f32.mrb[6].mxu0 }
 0x1e0   :  { %v211_v30 = vadd.f32 %v209_v25, %v1248_v26  ;;  %v938_v31 = vpop.f32.mrb[7].mxu0  ;;  %v196_v34 = vsel %vm195_vm3, %v1248_v26, -inf }
 0x1e2   :  { %v213_v32 = vmul.f32 %v212_v29, %v211_v30  ;;  %v1033_v30 = vld [vmem:[#allocation6 + $0x58] sm:$0xff]  }
 0x1e4   :  { %v214_v33 = vsel %vm195_vm3, %v213_v32, -inf }
 0x1e5   :  { %215 = vmax.xlane.f32.xlu0 %v214_v33 }
 0x1e9   :  { %197 = vmax.xlane.f32.xlu0 %v196_v34 }
 0x1ff   :  { %298 = vrot.lane.b32.xlu0 %v296_v45, %s1148_s0  ;;  %v1037_v45 = vld [vmem:[#allocation6 + $0x78] sm:$0xff]  }
 0x272   :  { %v216_v35 = vpop.xlane.xlu0 %215 }
 0x273   :  { %v217_v36 = vsub.f32 %v213_v32, %v216_v35 }
 0x275   :  { %v218_v37 = vmul.f32 1.442695, %v217_v36 }
 0x277   :  { %1050 = vpow2.f32 %v218_v37 }
 0x281   :  { %v1051_v38 = vpop.eup %1050 }
 0x282   :  { %v220_v39 = vsel %vm195_vm3, %v1051_v38, 0.0 }
 0x283   :  { %221 = vadd.xlane.f32.xlu1 %v220_v39 }
 0x310   :  { %v222_v46 = vpop.xlane.xlu1 %221 }
 0x311   :  { %1052 = vrcp.f32 %v222_v46  ;;  %v436_v46 = vsub.s32 5, %v1236_v10 }
 0x31b   :  { %v1053_v47 = vpop.eup %1052 }
 0x31c   :  { %v1266_v48 = vmul.f32 %v1053_v47, %v1051_v38  ;;  %v437_v47 = vrot.slane %v292_v44, %v436_v46  ;;  %v1041_v44 = vld [vmem:[#allocation6 + $0x98] sm:$0xff]  }
 0x31e   :  { %v225_v49 = vpack.c.bf16 %v1266_v48, %v1266_v48 }
 0x320   :  { %942 = vmatmul.mubr.msk.bf16.vlgmr.msra.gmra.mrb[0].mxu1 %vm195_vm3, %v225_v49 }
 0x321   :  { %959 = vmatprep.mubr.msk.bf16.mxu1 %vm1151_vm0, %v1150_v0  ;;  %958 = vmatpush3.bf16.msra.mxu1 %v1033_v30 }
 0x322   :  { %963 = vmatprep.subr.bf16.mxu1 %v1150_v0 }
 0x3f3   :  { %v1274_v54 = vpop.f32.mrb[0].mxu1 }
 0x3f4   :  { %275 = vrot.lane.b32.xlu1 %v1274_v54, %s1148_s0  ;;  %v943_v56 = vpop.f32.mrb[1].mxu1 }
 0x3f5   :  { %v271_v58 = vpop.f32.mrb[2].mxu1 }
 0x3f6   :  { %v944_v59 = vpop.f32.mrb[3].mxu1  ;;  %v1039_v58 = vld [vmem:[#allocation6 + $0x88] sm:$0xff]  }
 0x3f7   :  { %v1042_v59 = vld [vmem:[#allocation6 + $0xa0] sm:$0xff]  }
 0x3f8   :  { %286 = vrot.lane.b32.xlu1 %v284_v57, %s1148_s0  ;;  %v1038_v57 = vld [vmem:[#allocation6 + $0x80] sm:$0xff]  }
 0x466   :  { %v276_v62 = vpop.permute.xlu1 %275 }
 0x467   :  { %v278_v63 = vadd.f32 %v276_v62, %v1241_v15  ;;  %v1045_v62 = vld [vmem:[#allocation6 + $0xb8] sm:$0xff]  }
 0x46a   :  { %v287_v1 = vpop.permute.xlu1 %286 }
 0x46b   :  { %v289_v2 = vadd.f32 %v287_v1, %v278_v63  ;;  %v1046_v63 = vld [vmem:[#allocation6 + $0xc0] sm:$0xff]   ;;  %v1047_v1 = vld [vmem:[#allocation6 + $0xc8] sm:$0xff]  }
 0x46d   :  { %v290_v4 = vmax.f32 %v289_v2, 0.0  ;;  %v498_v2 = vld [vmem:[#allocation6 + $0xe0] sm:$0x8] }
 0x46f   :  { %v316_v5 = vpack.c.bf16 %v290_v4, %v290_v4  ;;  %v499_v4 = vunpack.c.l.bf16 %v498_v2 }
 0x471   :  { %330 = vrot.lane.b32.xlu1 %v316_v5, %s1148_s0  ;;  %v502_v5 = vsub.s32 6, %v1236_v10 }
 0x4e3   :  { %v331_v6 = vpop.permute.xlu1 %330 }
 0x4e4   :  { %954 = vmatmul.mubr.msk.bf16.vlgmr.msra.gmra.mrb[8].mxu0 %vm151_vm2, %v331_v6  ;;  %v503_v6 = vrot.slane %v499_v4, %v502_v5 }
 0x4e5   :  { %983 = vmatprep.mubr.msk.bf16.mxu0 %vm1151_vm0, %v1150_v0  ;;  %976 = vmatpush3.bf16.msra.mxu0 %v1038_v57 }
 0x4e6   :  { %977 = vmatprep.subr.bf16.mxu0 %v1150_v0 }
 0x4e9   :  { %978 = vmatpush3.bf16.msra.mxu0 %v1039_v58 }
 0x4ea   :  { %979 = vmatprep.subr.bf16.mxu0 %v1150_v0 }
 0x4ed   :  { %980 = vmatpush3.bf16.msra.mxu0 %v1040_v42 }
 0x4ee   :  { %981 = vmatprep.subr.bf16.mxu0 %v1150_v0 }
 0x4f1   :  { %982 = vmatpush3.bf16.msra.mxu0 %v1041_v44 }
 0x5b7   :  { %v393_v9 = vpop.f32.mrb[8].mxu0 }
 0x5b8   :  { %v1289_v11 = vadd.f32 %v393_v9, %v328_v8  ;;  %v955_v12 = vpop.f32.mrb[9].mxu0 }
 0x5b9   :  { %v396_v14 = vpop.f32.mrb[10].mxu0 }
 0x5ba   :  { %v400_v15 = vmin.f32 %v1289_v11, 20.0  ;;  %v956_v16 = vpop.f32.mrb[11].mxu0  ;;  %vm399_vm6 = vcmp.gt.f32.partialorder %v1289_v11, 20.0 }
 0x5bc   :  { %v401_v17 = vmul.f32 1.442695, %v400_v15 }
 0x5be   :  { %1054 = vpow2.f32 %v401_v17 }
 0x5c8   :  { %v1055_v18 = vpop.eup %1054 }
 0x5c9   :  { %v403_v19 = vadd.f32 1.0, %v1055_v18  ;;  %v406_v20 = vmul.f32 -0.5, %v1055_v18  ;;  %v409_v22 = vand.u32 2147483647, %v1055_v18 }
 0x5cb   :  { %1056 = vlog2.f32 %v403_v19  ;;  %v407_v21 = vadd.f32 1.0, %v406_v20  ;;  %vm410_vm5 = vcmp.lt.f32.partialorder %v409_v22, 0.0004427343  ;;  %v1048_v20 = vld [vmem:[#allocation6 + $0xd0] sm:$0xff]   ;;  %v586_v22 = vsub.s32 7, %v1236_v10 }
 0x5cd   :  { %v408_v25 = vmul.f32 %v1055_v18, %v407_v21  ;;  %v1049_v21 = vld [vmem:[#allocation6 + $0xd8] sm:$0xff]  }
 0x5d5   :  { %v1057_v23 = vpop.eup %1056 }
 0x5d6   :  { %v405_v24 = vmul.f32 0.6931472, %v1057_v23  ;;  %v587_v23 = vrot.slane %v499_v4, %v586_v22 }
 0x5d8   :  { %v411_v27 = vsel %vm410_vm5, %v408_v25, %v405_v24  ;;  %vm830_vm5 = vcmask 908288  }
 0x5d9   :  { %v1294_v28 = vsel %vm399_vm6, %v1289_v11, %v411_v27 }
 0x5da   :  { %v413_v29 = vadd.f32 1e-10, %v1294_v28 }
 0x5dc   :  { %1058 = vrsqrt.f32 %v413_v29  ;;  %vm416_vm7 = vcmp.eq.f32.partialorder %v413_v29, inf  ;;  %v419_v33 = vand.u32 2147483648, %v413_v29  ;;  %vm418_vm8 = vcmp.eq.f32.partialorder %v413_v29, 0.0 }
 0x5e6   :  { %v1059_v31 = vpop.eup %1058 }
 0x5e7   :  { %v415_v32 = vmul.f32 %v1059_v31, %v413_v29 }
 0x5e9   :  { %v417_v34 = vsel %vm416_vm7, %v413_v29, %v415_v32 }
 0x5ea   :  { %v420_v35 = vsel %vm418_vm8, %v419_v33, %v417_v34  ;;  %v673_v33 = vld [vmem:[#allocation6 + $0xe4] sm:$0x1] }
 0x5eb   :  { %422 = vrot.lane.b32.xlu1 %v420_v35, %s1153_s1  ;;  %v674_v34 = vunpack.c.l.bf16 %v673_v33 }
 0x5ed   :  { %v678_v35 = vrot.slane %v674_v34, %v110_v13 }
 0x65d   :  { %v423_v36 = vpop.permute.xlu1 %422 }
 0x65e   :  { %v425_v37 = vmul.f32 %v423_v36, %v1221_v3  ;;  %v1036_v3 = vld [vmem:[#allocation6 + $0x70] sm:$0xff]  }
 0x660   :  { %427 = vrot.lane.b32.xlu1 %v425_v37, %s1154_s12 }
 0x6d2   :  { %v428_v38 = vpop.permute.xlu1 %427 }
 0x6d3   :  { %v1301_v39 = vadd.f32 %v428_v38, %v1289_v11 }
 0x6d5   :  { %v431_v41 = vpack.c.bf16 %v1301_v39, %v1301_v39 }
 0x6d7   :  { %960 = vmatmul.mubr.msk.bf16.vlgmr.msra.gmra.mrb[4].mxu1 %vm444_vm9, %v431_v41 }
 0x6d8   :  { %964 = vmatpush3.bf16.msra.mxu1 %v1034_v40  ;;  %971 = vmatprep.mubr.msk.bf16.mxu1 %vm1151_vm0, %v1150_v0 }
 0x6d9   :  { %965 = vmatprep.subr.bf16.mxu1 %v1150_v0 }
 0x6dc   :  { %966 = vmatpush3.bf16.msra.mxu1 %v1035_v43  ;;  %v198_v43 = vpop.xlane.xlu0 %197 }
 0x6dd   :  { %967 = vmatprep.subr.bf16.mxu1 %v1150_v0 }
 0x6e0   :  { %968 = vmatpush3.bf16.msra.mxu1 %v1036_v3  ;;  %v299_v3 = vpop.permute.xlu0 %298 }
 0x6e1   :  { %969 = vmatprep.subr.bf16.mxu1 %v1150_v0 }
 0x6e4   :  { %970 = vmatpush3.bf16.msra.mxu1 %v1037_v45  ;;  %v301_v45 = vadd.f32 %v299_v3, %v1274_v54 }
 0x6e5   :  { %987 = vmatprep.subr.bf16.mxu1 %v1150_v0 }
 0x6e6   :  { %v303_v46 = vmin.f32 %v301_v45, 20.0  ;;  %vm302_vm11 = vcmp.gt.f32.partialorder %v301_v45, 20.0 }
 0x7aa   :  { %v482_v49 = vpop.f32.mrb[4].mxu1 }
 0x7ab   :  { %v483_v50 = vadd.f32 %v482_v49, %v437_v47  ;;  %v961_v51 = vpop.f32.mrb[5].mxu1  ;;  %v199_v47 = vsub.f32 %v1248_v26, %v198_v43  ;;  %v304_v49 = vmul.f32 1.442695, %v303_v46 }
 0x7ac   :  { %v485_v52 = vpop.f32.mrb[6].mxu1 }
 0x7ad   :  { %v488_v53 = vmax.f32 %v483_v50, 0.0  ;;  %v962_v55 = vpop.f32.mrb[7].mxu1  ;;  %v200_v50 = vmul.f32 1.442695, %v199_v47 }
 0x7af   :  { %v489_v56 = vpack.c.bf16 %v488_v53, %v488_v53 }
 0x7b1   :  { %972 = vmatmul.mubr.msk.bf16.vlgmr.msra.gmra.mrb[8].mxu1 %vm151_vm2, %v489_v56 }
 0x7b2   :  { %1003 = vmatprep.mubr.msk.bf16.mxu1 %vm1151_vm0, %v1150_v0  ;;  %988 = vmatpush3.bf16.msra.mxu1 %v1042_v59  ;;  %vm824_vm0 = vcmask 785408  }
 0x7b3   :  { %989 = vmatprep.subr.bf16.mxu1 %v1150_v0 }
 0x7b6   :  { %990 = vmatpush3.bf16.msra.mxu1 %v1043_v60 }
 0x7b7   :  { %991 = vmatprep.subr.bf16.mxu1 %v1150_v0 }
 0x7ba   :  { %992 = vmatpush3.bf16.msra.mxu1 %v1044_v61 }
 0x7bb   :  { %993 = vmatprep.subr.bf16.mxu1 %v1150_v0 }
 0x7be   :  { %994 = vmatpush3.bf16.msra.mxu1 %v1045_v62 }
 0x7bf   :  { %995 = vmatprep.subr.bf16.mxu1 %v1150_v0 }
 0x7c2   :  { %996 = vmatpush3.bf16.msra.mxu1 %v1046_v63 }
 0x7c3   :  { %997 = vmatprep.subr.bf16.mxu1 %v1150_v0 }
 0x7c6   :  { %998 = vmatpush3.bf16.msra.mxu1 %v1047_v1 }
 0x7c7   :  { %999 = vmatprep.subr.bf16.mxu1 %v1150_v0 }
 0x7ca   :  { %1000 = vmatpush3.bf16.msra.mxu1 %v1048_v20 }
 0x7cb   :  { %1001 = vmatprep.subr.bf16.mxu1 %v1150_v0 }
 0x7ce   :  { %1002 = vmatpush3.bf16.msra.mxu1 %v1049_v21 }
 0x884   :  { %v565_v7 = vpop.f32.mrb[8].mxu1 }
 0x885   :  { %v566_v8 = vadd.f32 %v565_v7, %v503_v6  ;;  %v973_v9 = vpop.f32.mrb[9].mxu1 }
 0x886   :  { %v568_v12 = vpop.f32.mrb[10].mxu1 }
 0x887   :  { %v571_v14 = vmul.f32 0.5, %v566_v8  ;;  %v974_v15 = vpop.f32.mrb[11].mxu1 }
 0x888   :  { %v815_v15 = vsel %vm444_vm9, %v1289_v11, %v1294_v28 }
 0x889   :  { %1060 = vtanh.f32 %v571_v14 }
 0x88a   :  { %1062 = vpow2.f32 %v304_v49 }
 0x88b   :  { %1064 = vpow2.f32 %v200_v50 }
 0x893   :  { %v1061_v16 = vpop.eup %1060 }
 0x894   :  { %v573_v17 = vmul.f32 0.5, %v1061_v16  ;;  %v1063_v10 = vpop.eup %1062 }
 0x895   :  { %v1065_v13 = vpop.eup %1064  ;;  %v306_v51 = vadd.f32 1.0, %v1063_v10  ;;  %v309_v53 = vmul.f32 -0.5, %v1063_v10  ;;  %v312_v57 = vand.u32 2147483647, %v1063_v10 }
 0x896   :  { %v574_v18 = vadd.f32 0.5, %v573_v17  ;;  %v202_v52 = vsel %vm195_vm3, %v1065_v13, 0.0  ;;  %vm826_vm3 = vcmask 850944  }
 0x897   :  { %1066 = vlog2.f32 %v306_v51  ;;  %v310_v56 = vadd.f32 1.0, %v309_v53  ;;  %vm313_vm10 = vcmp.lt.f32.partialorder %v312_v57, 0.0004427343 }
 0x898   :  { %v575_v19 = vpack.c.bf16 %v574_v18, %v574_v18 }
 0x899   :  { %v311_v54 = vmul.f32 %v1063_v10, %v310_v56 }
 0x89a   :  { %984 = vmatmul.mubr.msk.bf16.vlgmr.msra.gmra.mrb[12].mxu0 %vm151_vm2, %v575_v19 }
 0x8a1   :  { %v1067_v55 = vpop.eup %1066 }
 0x8a2   :  { %v308_v58 = vmul.f32 0.6931472, %v1067_v55 }
 0x8a4   :  { %v314_v42 = vsel %vm313_vm10, %v311_v54, %v308_v58 }
 0x8a5   :  { %v315_v44 = vsel %vm302_vm11, %v301_v45, %v314_v42 }
 0x96d   :  { %v649_v24 = vpop.f32.mrb[12].mxu0 }
 0x96e   :  { %v650_v25 = vadd.f32 %v649_v24, %v587_v23  ;;  %v985_v27 = vpop.f32.mrb[13].mxu0 }
 0x96f   :  { %v652_v29 = vpop.f32.mrb[14].mxu0 }
 0x970   :  { %v655_v30 = vmax.f32 %v650_v25, 0.0  ;;  %v986_v31 = vpop.f32.mrb[15].mxu0 }
 0x972   :  { %v656_v32 = vpack.c.bf16 %v655_v30, %v655_v30 }
 0x974   :  { %1004 = vmatmul.mubr.bf16.vlgmr.msra.gmra.mrb[12].mxu1 %v656_v32 }
 0xa47   :  { %v761_v36 = vpop.f32.mrb[12].mxu1 }
 0xa48   :  { %v762_v0 = vadd.f32 %v761_v36, %v678_v35  ;;  %v1005_v37 = vpop.f32.mrb[13].mxu1 }
 0xa49   :  { %v764_v38 = vpop.f32.mrb[14].mxu1 }
 0xa4a   :  { %v1006_v40 = vpop.f32.mrb[15].mxu1  ;;  %v771_v41 = vmul.f32 %v762_v0, %v762_v0  ;;  %v767_v61 = vmul.f32 0.5, %v762_v0 }
 0xa4c   :  { %773 = vrot.lane.b32.xlu1 %v771_v41, %s1155_s13  ;;  %1068 = vtanh.f32 %v767_v61 }
 0xa56   :  { %v1069_v62 = vpop.eup %1068 }
 0xa57   :  { %v769_v63 = vmul.f32 0.5, %v1069_v62 }
 0xa59   :  { %v770_v1 = vadd.f32 0.5, %v769_v63 }
 0xa70   :  { %203 = vadd.xlane.f32.xlu1 %v202_v52 }
 0xa81   :  { %784 = vrot.lane.b32.xlu1 %v1301_v39, %s1156_s14 }
 0xa85   :  { %792 = vrot.lane.b32.xlu1 %v315_v44, %s1157_s15 }
 0xa89   :  { %796 = vrot.lane.b32.xlu1 %v1248_v26, %s1158_s16 }
 0xabe   :  { %v774_v59 = vpop.permute.xlu1 %773 }
 0xabf   :  { %v777_v60 = vsel %vm776_vm12, %v774_v59, 0.0 }
 0xac0   :  { %778 = vadd.xlane.f32.xlu0 %v777_v60 }
 0xad6   :  { %788 = vrot.lane.b32.xlu0 %v301_v45, %s1157_s15 }
 0xada   :  { %812 = vrot.lane.b32.xlu0 %v770_v1, %s1159_s17 }
 0xafd   :  { %v204_v39 = vpop.xlane.xlu1 %203 }
 0xafe   :  { %1070 = vrcp.f32 %v204_v39 }
 0xb01   :  { %v785_v8 = vpop.permute.xlu1 %784 }
 0xb02   :  { %v816_v17 = vsel %vm62_vm1, %v815_v15, %v785_v8 }
 0xb05   :  { %v793_v9 = vpop.permute.xlu1 %792 }
 0xb08   :  { %v1071_v2 = vpop.eup %1070 }
 0xb09   :  { %v206_v4 = vmul.f32 %v1071_v2, %v1065_v13  ;;  %v797_v12 = vpop.permute.xlu1 %796 }
 0xb0b   :  { %800 = vrot.lane.b32.xlu1 %v206_v4, %s1154_s12 }
 0xb0f   :  { %804 = vrot.lane.b32.xlu1 %v1266_v48, %s1152_s2 }
 0xb4d   :  { %v779_v26 = vpop.xlane.xlu0 %778 }
 0xb4e   :  { %v780_v5 = vmax.f32 %v779_v26, 1e-24 }
 0xb50   :  { %1072 = vrsqrt.f32 %v780_v5 }
 0xb51   :  { %v789_v14 = vpop.permute.xlu0 %788 }
 0xb52   :  { %v818_v48 = vsel %vm817_vm13, %v816_v17, %v789_v14 }
 0xb53   :  { %v819_v18 = vsel %vm151_vm2, %v818_v48, %v793_v9 }
 0xb54   :  { %v821_v20 = vsel %vm820_vm14, %v819_v18, %v797_v12 }
 0xb55   :  { %v813_v11 = vpop.permute.xlu0 %812 }
 0xb5a   :  { %v1073_v6 = vpop.eup %1072 }
 0xb5b   :  { %v782_v7 = vmul.f32 %v1073_v6, %v762_v0 }
 0xb5d   :  { %808 = vrot.lane.b32.xlu1 %v782_v7, %s1160_s18 }
 0xb7d   :  { %v801_v16 = vpop.permute.xlu1 %800 }
 0xb7e   :  { %v823_v21 = vsel %vm822_vm15, %v821_v20, %v801_v16 }
 0xb81   :  { %v805_v19 = vpop.permute.xlu1 %804 }
 0xb82   :  { %v825_v22 = vsel %vm824_vm0, %v823_v21, %v805_v19 }
 0xbcf   :  { %v809_v23 = vpop.permute.xlu1 %808 }
 0xbd0   :  { %v827_v28 = vsel %vm826_vm3, %v825_v22, %v809_v23 }
 0xbd1   :  { %v829_v24 = vsel %vm828_vm4, %v827_v28, %v813_v11 }
 0xbd2   :  { %v831_v25 = vsel %vm830_vm5, %v829_v24, 0.0 }
 0xbd3   :  { %832 = vst [vmem:[#allocation8] sm:$0xff] %v831_v25 }
 0xbd4   :  { %1129 = shalt.err (!%p1126_p6)
}
 0xbd5   :  { %s1130_s24 = scalar_lea.hbm %s1361_s3, 128 }
 0xbd6   :  { %p1131_p7 = scmp.ne.s32.totalorder %s1361_s3, %s1130_s24  ;;  %p1134_p8 = scmp.lt.u32.totalorder %s1130_s24, %s1361_s3 }
 0xbd8   :  { %p1136_p9 = pnand %p1134_p8, %p1131_p7 }
 0xbda   :  { %1139 = shalt.err (!%p1136_p9)
}
 0xbdb   :  { %842 = dma.vmem_to_hbm [thread:$0]  %s840_s20, 128, %s1361_s3, [#allocation5]  }
 0xbdc   :  { %1144 = dma.done.wait [#allocation5], 128  }
 0xbdd   :  { %1145 = vsyncadd [#allocation5], 4294967168 }
 0xbde   :  { %846 = vsyncpa [#allocation4], 1 }
 0xbdf   :  { %847 = vsyncpa [#allocation7], 1 }
 0xbe0   :  { %848 = vsyncpa [#allocation5], 1 }

</bundles_post_ra>
